<compile_context>
chip_gen: v6e
topology: v6e:2x2x1
jax: 0.10.0
libtpu: 0.0.40
codegen_flags: <defaults>
</compile_context>

<pallas_src>
import functools
import math

import jax
import jax.numpy as jnp
from jax.experimental import pallas as pl
from jax.experimental.pallas import tpu as pltpu


# ----------------------------------------------------------------------------
# "Module init": build the sinusoidal PE table (identical to the PyTorch code)
# and pre-flatten / pre-cast it once so the per-call hot path is just the kernel.
# ----------------------------------------------------------------------------
def make_positional_encoding(seq_len: int, d_model: int) -> jnp.ndarray:
    assert d_model % 2 == 0, "d_model must be even (same limitation as the PyTorch module)"
    position = jnp.arange(seq_len, dtype=jnp.float32)[:, None]               # (S, 1)
    div_term = jnp.exp(
        jnp.arange(0, d_model, 2, dtype=jnp.float32) * (-math.log(10000.0) / d_model)
    )                                                                        # (D/2,)
    pe = jnp.zeros((seq_len, d_model), dtype=jnp.float32)
    pe = pe.at[:, 0::2].set(jnp.sin(position * div_term))
    pe = pe.at[:, 1::2].set(jnp.cos(position * div_term))
    return pe                                                                # (S, D)


def prepare_pe(pe: jnp.ndarray, seq_len: int, dtype) -> jnp.ndarray:
    """Hoisted out of the per-call path: slice, cast and flatten the PE table."""
    S, D = seq_len, pe.shape[1]
    return pe[:S, :].astype(dtype).reshape(1, S * D)                         # (1, S*D)


# ----------------------------------------------------------------------------
# Kernel
# ----------------------------------------------------------------------------
def _pe_add_kernel(x_ref, pe_ref, o_ref):
    # x_ref/o_ref: (tB, tC) lane-dense tiles of the flattened (B, S*D) array.
    # pe_ref:      (1,  tC) tile of the flattened PE row, broadcast over batch rows.
    o_ref[...] = x_ref[...] + pe_ref[...]
    # Eval-mode dropout is identity; nothing further to do.
    # TODO(synk): fuse training-mode dropout here (PRNG bits + jnp.where) — VPU is idle.


def _round_up(x: int, m: int) -> int:
    return ((x + m - 1) // m) * m


def _vmem_config():
    """Per-generation (budget_for_tiles, vmem_limit_bytes)."""
    try:
        kind = jax.devices()[0].device_kind.lower()
    except Exception:  # pragma: no cover
        kind = ""
    if ("v5 lite" in kind) or ("v5e" in kind) or ("v5lite" in kind):
        return 12 << 20, 16 << 20        # v5e: 16 MiB scoped default — stay under it
    if ("v7" in kind) or ("tpu7" in kind):
        return 24 << 20, 28 << 20        # v7x: 32 MiB scoped default / 64 MiB physical
    if "v6" in kind:
        return 20 << 20, 32 << 20        # v6e: 32 MiB scoped default / 128 MiB physical
    return 12 << 20, 16 << 20            # unknown: conservative, safe everywhere


def _choose_tiles(B: int, L: int, dtype, vmem_budget_bytes: int):
    """Pick (tB, tC) tiles: legal blocks, dtype-aware sublane packing, correct
    (sublane-padded) VMEM accounting, and >= ~8 column tiles when possible."""
    itemsize = jnp.dtype(dtype).itemsize
    sublane = 32 // itemsize             # 8 for f32, 16 for bf16, 32 for int8/fp8
    tB = B if B <= sublane else sublane  # full batch when small, else one packed tile

    if L <= 128:
        # Lane dim equal to the full array dim is always a legal block.
        return tB, L

    def pad_rows(r: int) -> int:
        return _round_up(r, sublane)

    # Per-column-element VMEM bytes: double-buffered x + out tiles plus the
    # double-buffered (1, tC) PE tile, all padded to full sublane tiles.
    per_col_bytes = itemsize * (2 * pad_rows(tB) + 2 * pad_rows(tB) + 2 * pad_rows(1))
    max_tc = max(128, (vmem_budget_bytes // per_col_bytes) // 128 * 128)

    # Target >= ~8 column tiles so both v7x TensorCores get work and the
    # software pipeline has enough steps to hide the first/last DMA.
    target_tc = max(128, _round_up(-(-L // 8), 128))
    tc = max(128, min(max_tc, target_tc))
    # Interior tiles are multiples of 128; at most one masked edge tile when
    # L % 128 != 0 (tc never exceeds L here, so no block-wider-than-array case).
    return tB, tc


# ----------------------------------------------------------------------------
# Wrapper (jitted; x is donated so the kernel writes in place via the alias)
# ----------------------------------------------------------------------------
@functools.partial(jax.jit, donate_argnums=(0,))
def positional_embedding(x: jnp.ndarray, pe_flat: jnp.ndarray) -> jnp.ndarray:
    """x: (B, S, D); pe_flat: (1, S*D) pre-cast flattened PE row. Returns x + pe."""
    B, S, D = x.shape
    L = S * D
    assert pe_flat.shape == (1, L) and pe_flat.dtype == x.dtype
    itemsize = jnp.dtype(x.dtype).itemsize

    # Lane-dense layout: flatten (S, D) -> S*D so stores are full-width vst.
    x_flat = x.reshape(B, L)

    vmem_budget, vmem_limit = _vmem_config()
    tB, tC = _choose_tiles(B, L, x.dtype, vmem_budget)
    grid = (pl.cdiv(L, tC), pl.cdiv(B, tB))          # column tiles OUTER, batch INNER

    bytes_accessed = 2 * B * L * itemsize + L * itemsize   # read x + write out + read pe

    out_flat = pl.pallas_call(
        _pe_add_kernel,
        out_shape=jax.ShapeDtypeStruct((B, L), x.dtype),
        grid_spec=pltpu.PrefetchScalarGridSpec(
            num_scalar_prefetch=0,
            grid=grid,
            in_specs=[
                # x tile: depends on both grid axes.
                pl.BlockSpec((tB, tC), lambda c, b: (b, c)),
                # PE tile: constant across the inner batch axis -> DMA'd once per column tile.
                pl.BlockSpec((1, tC), lambda c, b: (0, c)),
            ],
            out_specs=pl.BlockSpec((tB, tC), lambda c, b: (b, c)),
        ),
        compiler_params=pltpu.CompilerParams(
            dimension_semantics=("parallel", "parallel"),
            vmem_limit_bytes=vmem_limit,
        ),
        cost_estimate=pl.CostEstimate(
            flops=B * L, transcendentals=0, bytes_accessed=bytes_accessed
        ),
        # Pure elementwise update of x: reuse its HBM buffer for the output.
        input_output_aliases={0: 0},
    )(x_flat, pe_flat)

    return out_flat.reshape(B, S, D)


if __name__ == "__main__":
    # Module config (small, consistent with the forward pass)
    d_model = 32
    seq_len = 8
    dropout = 0.0  # eval-mode / identity dropout

    batch = 2
    key = jax.random.PRNGKey(0)
    x = jax.random.normal(key, (batch, seq_len, d_model), dtype=jnp.float32)

    pe = make_positional_encoding(seq_len, d_model)
    pe_flat = prepare_pe(pe, seq_len, x.dtype)        # module-init hoist

    # Reference computed BEFORE the kernel call (x is donated into the kernel).
    ref = x + pe[None, :seq_len, :]

    out = positional_embedding(x, pe_flat)
    out = jax.block_until_ready(out)

    assert out.shape == (batch, seq_len, d_model)
    assert jnp.allclose(out, ref, atol=1e-6), "mismatch vs reference"

    print("KERNEL_OK")
</pallas_src>

<mosaic_0001>
module attributes {stable_mosaic.version = 11 : i64} {
  func.func @_pe_add_kernel(%arg0: i32, %arg1: i32, %arg2: memref<2x128xf32, #tpu.memory_space<vmem>>, %arg3: memref<1x128xf32, #tpu.memory_space<vmem>>, %arg4: memref<2x128xf32, #tpu.memory_space<vmem>>) attributes {dimension_semantics = [#tpu.dimension_semantics<parallel>, #tpu.dimension_semantics<parallel>], iteration_bounds = array<i64: 2, 1>, scalar_prefetch = 0 : i64, scratch_operands = 0 : i64, tpu.core_type = #tpu.core_type<tc>, window_params = [{transform_indices = @transform_0, window_bounds = array<i64: 2, 128>}, {transform_indices = @transform_1, window_bounds = array<i64: 1, 128>}, {transform_indices = @transform_2, window_bounds = array<i64: 2, 128>}]} {
    %c0 = arith.constant 0 : index
    %c0_0 = arith.constant 0 : index
    %0 = vector.load %arg2[%c0, %c0_0] : memref<2x128xf32, #tpu.memory_space<vmem>>, vector<2x128xf32>
    %c0_1 = arith.constant 0 : index
    %c0_2 = arith.constant 0 : index
    %1 = vector.load %arg3[%c0_1, %c0_2] : memref<1x128xf32, #tpu.memory_space<vmem>>, vector<1x128xf32>
    %2 = vector.broadcast %1 : vector<1x128xf32> to vector<2x128xf32>
    %3 = arith.addf %0, %2 : vector<2x128xf32>
    %c0_3 = arith.constant 0 : index
    %c0_4 = arith.constant 0 : index
    %4 = vector.load %arg4[%c0_3, %c0_4] : memref<2x128xf32, #tpu.memory_space<vmem>>, vector<2x128xf32>
    tpu.vector_store %arg4[%c0_3, %c0_4], %3 {strides = array<i32>} : memref<2x128xf32, #tpu.memory_space<vmem>>, vector<2x128xf32>,
    return
  }
  func.func @transform_0(%arg0: i32, %arg1: i32) -> (i32, i32) {
    %c0_i32 = arith.constant 0 : i32
    return %arg1, %arg0 : i32, i32
  }
  func.func @transform_1(%arg0: i32, %arg1: i32) -> (i32, i32) {
    %c0_i32 = arith.constant 0 : i32
    %c0_i32_0 = arith.constant 0 : i32
    return %c0_i32, %arg0 : i32, i32
  }
  func.func @transform_2(%arg0: i32, %arg1: i32) -> (i32, i32) {
    %c0_i32 = arith.constant 0 : i32
    return %arg1, %arg0 : i32, i32
  }
}

</mosaic_0001>

<bundles_post_ra>
// kernel: positional_embedding.1
= control target key start
LH: loop header
LB: loop body
LE: loop exit
PB: predicated region body
PF: predicated region fallthrough
CT: control target
= control target key end

     0   :  { %s364_s9 = smov 0   ;;  %s366_s10 = smov 0   ;;  %s383_s0 = inlined_call_operand.vmem [shape: f32[2,256], index: 0, kind: input, shape index: {}, may-alias: {0,2}]   ;;  %s384_s1 = inlined_call_operand.vmem [shape: f32[1,256], index: 1, kind: input, shape index: {}]   ;;  %s385_s2 = inlined_call_operand.vmem [shape: f32[2,256], index: 2, kind: output, shape index: {}, may-alias: {0,2}]  }
   0x1   :  { %s345_s11 = smov 0  }
   0x2 LB: > { %s24_s12 = sadd.s32 1, %s343_s10  ;;  %p295_p0 = scmp.ge.s32.totalorder %s347_s11, 1  ;;  %s347_s11 = sphi %s345_s11, %s12_s11   ;;  %s343_s10 = sphi %s366_s10, %s387_s10   ;;  %s339_s9 = sphi %s364_s9, %s386_s9  }
   0x3   : > { %p26_p1 = scmp.ge.s32.totalorder %s24_s12, 2  ;;  %p139_p2 = scmp.lt.s32.totalorder %s347_s11, 3 }
   0x5   : > { %s389_s12 = smov (%p26_p1, %s24_s12), 0  ;;  %p140_p3 = pnand %p295_p0, %p139_p2 }
   0x6   : > { %p172_p4 = scmp.lt.s32.totalorder (!%p140_p3), %s339_s9, 1 }
   0x7   : > { %143 = sbr.rel (%p140_p3) target bundleno = 19 (0x13), region = 28 }
   0xc   : > { %s391_s9 = smov (!%p172_p4, %s339_s9), 1 }
   0xd   : > { %s296_s13 = sshll.u32 %s391_s9, 1  ;;  %s180_s16 = scalar_lea.vmem %s384_s1, %s391_s9 }
   0xe   : > { %s177_s19 = scalar_lea.vmem %s383_s0, %s296_s13  ;;  %v298_v0 = vld [vmem:[%s180_s16] ss:$0 sm:$0xff]  ;;  %s188_s22 = scalar_lea.vmem %s385_s2, %s296_s13 }
   0xf   : > { %v189_v1 = vld [vmem:[%s177_s19] sm:$0x3] }
  0x10   : > { %v197_v2 = vadd.f32 %v298_v0, %v189_v1 }
  0x12   : > { %198 = vst [vmem:[%s188_s22] sm:$0x3] %v197_v2 }
  0x13 PF: > { %s12_s11 = sadd.s32 1, %s347_s11   ;;  %s386_s9 = smov %s343_s10 }
  0x14   : > { %p9_p5 = scmp.ge.s32.totalorder %s12_s11, 4   ;;  %s387_s10 = smov %s389_s12 }
  0x16   :  { %11 = sbr.rel (!%p9_p5) target bundleno = 2 (0x2), region = 61 }

</bundles_post_ra>
